<compile_context>
chip_gen: v7x
topology: tpu7x:2x2x1
jax: 0.10.0
libtpu: 0.0.40
codegen_flags: <defaults>
</compile_context>

<pallas_src>
import numpy as np
import jax
import jax.numpy as jnp
from jax.experimental import pallas as pl
from jax.experimental.pallas import tpu as pltpu

# Synthetic stand-in for Variables.processed_non_aux_cols_by_type
# (type -> list of per-variable processed-column index lists).
PROCESSED_NON_AUX_COLS_BY_TYPE = {
    "continuous":  [[0], [1], [2]],              # ReLU (activation_for_continuous)
    "binary":      [[3], [4]],                   # Sigmoid
    "categorical": [[5, 6, 7, 8], [9, 10, 11]],  # per-variable Softmax
}
NUM_PROCESSED_NON_AUX_COLS = 12


def _round_up(n, m):
    return ((n + m - 1) // m) * m


def _build_ranges():
    """Static per-kind contiguous column ranges.

    Returns (relu_ranges, sigmoid_ranges, softmax_groups, zero_ranges), each a
    tuple of (start, size). Softmax groups stay per-variable; relu/sigmoid
    ranges are merged when adjacent. zero_ranges = columns covered by no
    variable (stay 0, matching torch.zeros_like).
    """
    relu, sigm, smax = [], [], []
    for var_type, per_var in PROCESSED_NON_AUX_COLS_BY_TYPE.items():
        for idxs in per_var:
            idxs = list(idxs)
            # azua processed columns for one variable are contiguous
            assert idxs == list(range(idxs[0], idxs[0] + len(idxs)))
            rng = (idxs[0], len(idxs))
            if var_type in ("continuous", "text"):
                relu.append(rng)
            elif var_type == "binary":
                sigm.append(rng)
            elif var_type.startswith("categorical"):
                smax.append(rng)
            else:
                raise ValueError(var_type)

    def merge(ranges):
        ranges = sorted(ranges)
        out = []
        for s, sz in ranges:
            if out and out[-1][0] + out[-1][1] == s:
                out[-1] = (out[-1][0], out[-1][1] + sz)
            else:
                out.append((s, sz))
        return tuple(out)

    relu_r, sigm_r, smax_r = merge(relu), merge(sigm), tuple(sorted(smax))

    covered = sorted(list(relu_r) + list(sigm_r) + list(smax_r))
    zeros, pos = [], 0
    for s, sz in covered:
        if s > pos:
            zeros.append((pos, s - pos))
        pos = s + sz
    if pos < NUM_PROCESSED_NON_AUX_COLS:
        zeros.append((pos, NUM_PROCESSED_NON_AUX_COLS - pos))
    return relu_r, sigm_r, smax_r, tuple(zeros)


def _make_kernel(relu_ranges, sigmoid_ranges, softmax_groups, zero_ranges):
    def kernel(x_ref, o_ref):
        # x_ref / o_ref: (D, bt) — feature columns on sublanes, batch on lanes.
        # All slices below are static; every load/store is lane-dense (128 lanes).
        for s, sz in relu_ranges:
            v = x_ref[s:s + sz, :].astype(jnp.float32)
            o_ref[s:s + sz, :] = jnp.maximum(v, 0.0).astype(o_ref.dtype)

        for s, sz in sigmoid_ranges:
            v = x_ref[s:s + sz, :].astype(jnp.float32)
            o_ref[s:s + sz, :] = jax.nn.sigmoid(v).astype(o_ref.dtype)

        for s, sz in softmax_groups:
            g = x_ref[s:s + sz, :].astype(jnp.float32)            # (sz, bt)
            # Group-local max: unrolled pairwise max over <=4 sublane rows
            # (plain VPU ops on lane-dense (1, bt) slices; no XLU 128-lane reduce).
            m = g[0:1, :]
            for r in range(1, sz):
                m = jnp.maximum(m, g[r:r + 1, :])
            e = jnp.exp(g - m)                                    # exp only on group rows
            denom = e[0:1, :]
            for r in range(1, sz):
                denom = denom + e[r:r + 1, :]
            # Approx reciprocal on the EUP slot + one Newton-Raphson refinement:
            # rel err ~1e-7, well inside the 1e-5 reference tolerance.
            rcp = pl.reciprocal(denom, approx=True)
            rcp = rcp * (2.0 - denom * rcp)
            o_ref[s:s + sz, :] = (e * rcp).astype(o_ref.dtype)

        for s, sz in zero_ranges:
            # torch.zeros_like: uncovered columns stay zero (none in this config).
            o_ref[s:s + sz, :] = jnp.zeros((sz, o_ref.shape[1]), o_ref.dtype)

    return kernel


def _choose_batch_tile(B, batch_tile):
    """Pick the lane tile: multiple of 128 (or the full B for small inputs),
    capped so the grid has >= 2 steps when B > 256 (keeps both v7x TCs busy)."""
    if B <= 256:
        return B  # single full-extent block; no 128-alignment needed
    half = _round_up(pl.cdiv(B, 2), 128)
    bt = min(_round_up(batch_tile, 128), half)
    return max(bt, 128)


def featurewise_activation(data, *, batch_tile=32768):
    """Apply per-feature activations. data: (batch, NUM_PROCESSED_NON_AUX_COLS)."""
    if data.ndim != 2 or data.shape[-1] != NUM_PROCESSED_NON_AUX_COLS:
        # TODO(synk): 3-D (count, batch, D) path not implemented — PyTorch's
        # Softmax(dim=1) there would normalize over the batch axis, which looks
        # unintended, so the guard is kept.
        raise ValueError(
            f"expected (batch, {NUM_PROCESSED_NON_AUX_COLS}), got {data.shape}")

    B, D = data.shape
    itemsize = jnp.dtype(data.dtype).itemsize

    # Lane-dense relayout: features -> sublanes, batch -> lanes. Transposes are
    # wrapper-side layout plumbing (cheaper than ~10.7x lane waste in-kernel);
    # fuse into the producer/consumer when integrating.
    x_t = data.T                                                  # (D, B)

    relu_ranges, sigmoid_ranges, softmax_groups, zero_ranges = _build_ranges()
    kernel = _make_kernel(relu_ranges, sigmoid_ranges, softmax_groups, zero_ranges)

    bt = _choose_batch_tile(B, batch_tile)
    grid = (pl.cdiv(B, bt),)   # ragged trailing tile handled by Pallas block masking
    # True VMEM footprint: D pads to 16 sublanes -> 16*bt*4 B per buffer;
    # in+out, double-buffered => 4x. bt=32768 -> ~8 MiB; fits every
    # generation's scoped-VMEM default (incl. v7x 64 MiB total).

    n_sig = sum(sz for _, sz in sigmoid_ranges)
    n_smax = sum(sz for _, sz in softmax_groups)
    cost = pl.CostEstimate(
        flops=int(8 * B * D),
        transcendentals=int(B * (n_sig + n_smax + len(softmax_groups))),
        bytes_accessed=int(2 * B * D * itemsize),
    )

    out_t = pl.pallas_call(
        kernel,
        out_shape=jax.ShapeDtypeStruct((D, B), data.dtype),
        grid_spec=pltpu.PrefetchScalarGridSpec(
            num_scalar_prefetch=0,
            grid=grid,
            in_specs=[pl.BlockSpec((D, bt), lambda i: (0, i))],
            out_specs=pl.BlockSpec((D, bt), lambda i: (0, i)),
        ),
        compiler_params=pltpu.CompilerParams(
            dimension_semantics=("parallel",)),
        cost_estimate=cost,
    )(x_t)
    return out_t.T                                                # back to (B, D)


def _reference(data):
    x = np.asarray(data, dtype=np.float64)
    out = np.zeros_like(x)
    relu_ranges, sigmoid_ranges, softmax_groups, _ = _build_ranges()
    for s, sz in relu_ranges:
        out[:, s:s + sz] = np.maximum(x[:, s:s + sz], 0.0)
    for s, sz in sigmoid_ranges:
        out[:, s:s + sz] = 1.0 / (1.0 + np.exp(-x[:, s:s + sz]))
    for s, sz in softmax_groups:
        blk = x[:, s:s + sz]
        m = blk.max(axis=-1, keepdims=True)
        e = np.exp(blk - m)
        out[:, s:s + sz] = e / e.sum(axis=-1, keepdims=True)
    return out


if __name__ == "__main__":
    D = NUM_PROCESSED_NON_AUX_COLS

    # 1) Small batch, single full-extent block (grid=(1,)).
    x16 = jax.random.normal(jax.random.PRNGKey(0), (16, D), jnp.float32) * 2.0
    y16 = jax.block_until_ready(featurewise_activation(x16))
    np.testing.assert_allclose(np.asarray(y16, np.float64), _reference(x16),
                               rtol=1e-5, atol=1e-5)

    # 2) Batch not a multiple of 8/128 (full-extent single block).
    x19 = jax.random.normal(jax.random.PRNGKey(1), (19, D), jnp.float32) * 2.0
    y19 = jax.block_until_ready(featurewise_activation(x19))
    np.testing.assert_allclose(np.asarray(y19, np.float64), _reference(x19),
                               rtol=1e-5, atol=1e-5)

    # 3) Multi-step cdiv grid with a ragged trailing tile (default tiling -> grid=2).
    x300 = jax.random.normal(jax.random.PRNGKey(2), (300, D), jnp.float32) * 2.0
    y300 = jax.block_until_ready(featurewise_activation(x300))
    np.testing.assert_allclose(np.asarray(y300, np.float64), _reference(x300),
                               rtol=1e-5, atol=1e-5)

    # 4) Explicit smaller tile -> grid=3 with partial last block.
    y300b = jax.block_until_ready(featurewise_activation(x300, batch_tile=128))
    np.testing.assert_allclose(np.asarray(y300b, np.float64), _reference(x300),
                               rtol=1e-5, atol=1e-5)

    print("KERNEL_OK")
</pallas_src>

<mosaic_0001>
module attributes {stable_mosaic.version = 11 : i64} {
  func.func @kernel(%arg0: i32, %arg1: memref<12x16xf32, #tpu.memory_space<vmem>>, %arg2: memref<12x16xf32, #tpu.memory_space<vmem>>) attributes {dimension_semantics = [#tpu.dimension_semantics<parallel>], iteration_bounds = array<i64: 1>, scalar_prefetch = 0 : i64, scratch_operands = 0 : i64, tpu.core_type = #tpu.core_type<tc>, window_params = [{transform_indices = @transform_0, window_bounds = array<i64: 12, 16>}, {transform_indices = @transform_1, window_bounds = array<i64: 12, 16>}]} {
    %c0 = arith.constant 0 : index
    %c0_0 = arith.constant 0 : index
    %0 = vector.load %arg1[%c0, %c0_0] : memref<12x16xf32, #tpu.memory_space<vmem>>, vector<3x16xf32>
    %cst = arith.constant 0.000000e+00 : f32
    %1 = vector.broadcast %cst : f32 to vector<3x16xf32>
    %2 = arith.maximumf %0, %1 : vector<3x16xf32>
    %c0_1 = arith.constant 0 : index
    %c0_2 = arith.constant 0 : index
    %3 = vector.load %arg2[%c0_1, %c0_2] : memref<12x16xf32, #tpu.memory_space<vmem>>, vector<3x16xf32>
    tpu.vector_store %arg2[%c0_1, %c0_2], %2 {strides = array<i32>} : memref<12x16xf32, #tpu.memory_space<vmem>>, vector<3x16xf32>,
    %c3 = arith.constant 3 : index
    %c0_3 = arith.constant 0 : index
    %4 = vector.load %arg1[%c3, %c0_3] : memref<12x16xf32, #tpu.memory_space<vmem>>, vector<2x16xf32>
    %5 = arith.negf %4 : vector<2x16xf32>
    %6 = math.exp %5 : vector<2x16xf32>
    %cst_4 = arith.constant 1.000000e+00 : f32
    %7 = vector.broadcast %cst_4 : f32 to vector<2x16xf32>
    %8 = arith.addf %7, %6 : vector<2x16xf32>
    %9 = arith.divf %7, %8 : vector<2x16xf32>
    %c3_5 = arith.constant 3 : index
    %c0_6 = arith.constant 0 : index
    %10 = vector.load %arg2[%c3_5, %c0_6] : memref<12x16xf32, #tpu.memory_space<vmem>>, vector<2x16xf32>
    tpu.vector_store %arg2[%c3_5, %c0_6], %9 {strides = array<i32>} : memref<12x16xf32, #tpu.memory_space<vmem>>, vector<2x16xf32>,
    %c5 = arith.constant 5 : index
    %c0_7 = arith.constant 0 : index
    %11 = vector.load %arg1[%c5, %c0_7] : memref<12x16xf32, #tpu.memory_space<vmem>>, vector<4x16xf32>
    %12 = vector.extract_strided_slice %11 {offsets = [0, 0], sizes = [1, 16], strides = [1, 1]} : vector<4x16xf32> to vector<1x16xf32>
    %13 = vector.extract_strided_slice %11 {offsets = [1, 0], sizes = [1, 16], strides = [1, 1]} : vector<4x16xf32> to vector<1x16xf32>
    %14 = arith.maximumf %12, %13 : vector<1x16xf32>
    %15 = vector.extract_strided_slice %11 {offsets = [2, 0], sizes = [1, 16], strides = [1, 1]} : vector<4x16xf32> to vector<1x16xf32>
    %16 = arith.maximumf %14, %15 : vector<1x16xf32>
    %17 = vector.extract_strided_slice %11 {offsets = [3, 0], sizes = [1, 16], strides = [1, 1]} : vector<4x16xf32> to vector<1x16xf32>
    %18 = arith.maximumf %16, %17 : vector<1x16xf32>
    %19 = vector.broadcast %18 : vector<1x16xf32> to vector<4x16xf32>
    %20 = arith.subf %11, %19 : vector<4x16xf32>
    %21 = math.exp %20 : vector<4x16xf32>
    %22 = vector.extract_strided_slice %21 {offsets = [0, 0], sizes = [1, 16], strides = [1, 1]} : vector<4x16xf32> to vector<1x16xf32>
    %23 = vector.extract_strided_slice %21 {offsets = [1, 0], sizes = [1, 16], strides = [1, 1]} : vector<4x16xf32> to vector<1x16xf32>
    %24 = arith.addf %22, %23 : vector<1x16xf32>
    %25 = vector.extract_strided_slice %21 {offsets = [2, 0], sizes = [1, 16], strides = [1, 1]} : vector<4x16xf32> to vector<1x16xf32>
    %26 = arith.addf %24, %25 : vector<1x16xf32>
    %27 = vector.extract_strided_slice %21 {offsets = [3, 0], sizes = [1, 16], strides = [1, 1]} : vector<4x16xf32> to vector<1x16xf32>
    %28 = arith.addf %26, %27 : vector<1x16xf32>
    %29 = tpu.reciprocal %28 {approx = true} : vector<1x16xf32> -> vector<1x16xf32>
    %30 = arith.mulf %28, %29 : vector<1x16xf32>
    %cst_8 = arith.constant 2.000000e+00 : f32
    %31 = vector.broadcast %cst_8 : f32 to vector<1x16xf32>
    %32 = arith.subf %31, %30 : vector<1x16xf32>
    %33 = arith.mulf %29, %32 : vector<1x16xf32>
    %34 = vector.broadcast %33 : vector<1x16xf32> to vector<4x16xf32>
    %35 = arith.mulf %21, %34 : vector<4x16xf32>
    %c5_9 = arith.constant 5 : index
    %c0_10 = arith.constant 0 : index
    %36 = vector.load %arg2[%c5_9, %c0_10] : memref<12x16xf32, #tpu.memory_space<vmem>>, vector<4x16xf32>
    tpu.vector_store %arg2[%c5_9, %c0_10], %35 {strides = array<i32>} : memref<12x16xf32, #tpu.memory_space<vmem>>, vector<4x16xf32>,
    %c9 = arith.constant 9 : index
    %c0_11 = arith.constant 0 : index
    %37 = vector.load %arg1[%c9, %c0_11] : memref<12x16xf32, #tpu.memory_space<vmem>>, vector<3x16xf32>
    %38 = vector.extract_strided_slice %37 {offsets = [0, 0], sizes = [1, 16], strides = [1, 1]} : vector<3x16xf32> to vector<1x16xf32>
    %39 = vector.extract_strided_slice %37 {offsets = [1, 0], sizes = [1, 16], strides = [1, 1]} : vector<3x16xf32> to vector<1x16xf32>
    %40 = arith.maximumf %38, %39 : vector<1x16xf32>
    %41 = vector.extract_strided_slice %37 {offsets = [2, 0], sizes = [1, 16], strides = [1, 1]} : vector<3x16xf32> to vector<1x16xf32>
    %42 = arith.maximumf %40, %41 : vector<1x16xf32>
    %43 = vector.broadcast %42 : vector<1x16xf32> to vector<3x16xf32>
    %44 = arith.subf %37, %43 : vector<3x16xf32>
    %45 = math.exp %44 : vector<3x16xf32>
    %46 = vector.extract_strided_slice %45 {offsets = [0, 0], sizes = [1, 16], strides = [1, 1]} : vector<3x16xf32> to vector<1x16xf32>
    %47 = vector.extract_strided_slice %45 {offsets = [1, 0], sizes = [1, 16], strides = [1, 1]} : vector<3x16xf32> to vector<1x16xf32>
    %48 = arith.addf %46, %47 : vector<1x16xf32>
    %49 = vector.extract_strided_slice %45 {offsets = [2, 0], sizes = [1, 16], strides = [1, 1]} : vector<3x16xf32> to vector<1x16xf32>
    %50 = arith.addf %48, %49 : vector<1x16xf32>
    %51 = tpu.reciprocal %50 {approx = true} : vector<1x16xf32> -> vector<1x16xf32>
    %52 = arith.mulf %50, %51 : vector<1x16xf32>
    %cst_12 = arith.constant 2.000000e+00 : f32
    %53 = vector.broadcast %cst_12 : f32 to vector<1x16xf32>
    %54 = arith.subf %53, %52 : vector<1x16xf32>
    %55 = arith.mulf %51, %54 : vector<1x16xf32>
    %56 = vector.broadcast %55 : vector<1x16xf32> to vector<3x16xf32>
    %57 = arith.mulf %45, %56 : vector<3x16xf32>
    %c9_13 = arith.constant 9 : index
    %c0_14 = arith.constant 0 : index
    %58 = vector.load %arg2[%c9_13, %c0_14] : memref<12x16xf32, #tpu.memory_space<vmem>>, vector<3x16xf32>
    tpu.vector_store %arg2[%c9_13, %c0_14], %57 {strides = array<i32>} : memref<12x16xf32, #tpu.memory_space<vmem>>, vector<3x16xf32>,
    return
  }
  func.func @transform_0(%arg0: i32) -> (i32, i32) {
    %c0_i32 = arith.constant 0 : i32
    %c0_i32_0 = arith.constant 0 : i32
    return %c0_i32, %arg0 : i32, i32
  }
  func.func @transform_1(%arg0: i32) -> (i32, i32) {
    %c0_i32 = arith.constant 0 : i32
    %c0_i32_0 = arith.constant 0 : i32
    return %c0_i32, %arg0 : i32, i32
  }
}

</mosaic_0001>

<bundles_post_ra>
// kernel: tpu_custom_call.1
= control target key start
LH: loop header
LB: loop body
LE: loop exit
PB: predicated region body
PF: predicated region fallthrough
CT: control target
= control target key end

     0   :  { %6 = vsyncpa [#allocation3], 0  ;;  %s235_s0 = inlined_call_operand.hbm [shape: f32[12,16], index: 0, kind: input, shape index: {}]   ;;  %s236_s1 = inlined_call_operand.hbm [shape: f32[12,16], index: 1, kind: output, shape index: {}]  }
   0x1   :  { %7 = vsyncpa [#allocation4], 0  ;;  %s189_s6 = smov [#allocation2]   ;;  %s141_s10 = scalar_lea.hbm %s235_s0, 256 }
   0x2   :  { %s13_s7 = sshll.u32 %s189_s6, 4  ;;  %p142_p0 = scmp.ne.s32.totalorder %s235_s0, %s141_s10  ;;  %s14_s7 = int_to_ptr.vmem [resolvable:$true] %s13_s7 }
   0x3   :  { %p145_p1 = scmp.lt.u32.totalorder %s141_s10, %s235_s0 }
   0x5   :  { %p147_p2 = pnand %p145_p1, %p142_p0 }
   0x7   :  { %150 = shalt.err (!%p147_p2)
}
   0x8   :  { %s151_s15 = scalar_lea.vmem %s14_s7, 256  ;;  %p156_p4 = scmp.lt.s32.totalorder %s14_s7, %s14_s7 }
   0x9   :  { %p152_p3 = scmp.ne.s32.totalorder %s14_s7, %s151_s15  ;;  %p157_p5 = scmp.lt.s32.totalorder %s151_s15, %s151_s15 }
   0xb   :  { %p158_p6 = por %p157_p5, %p156_p4 }
   0xd   :  { %p159_p7 = pnand %p158_p6, %p152_p3 }
   0xf   :  { %162 = shalt.err (!%p159_p7)
}
  0x10   :  { %s190_s16 = smov 128   ;;  %s191_s17 = smov 8  }
  0x11   :  { %19 = dma.hbm_to_vmem [thread:$0]  %s235_s0, 256, %s14_s7, [#allocation3], %s190_s16, %s190_s16, %s191_s17  }
  0x12   :  { %185 = dma.done.wait [#allocation3], 256  }
  0x13   :  { %186 = vsyncadd [#allocation3], 4294967040  ;;  %v47_v0 = vlaneseq  ;;  %vm25_vm0 = vcmask 124928   ;;  %v23_v2 = vld [vmem:[#allocation2] sm:$0x7]  ;;  %vm34_vm1 = vcmask 123904  }
  0x14   :  { %v27_v3 = vld [vmem:[#allocation2 + $0x3] sm:$0x3]  ;;  %v36_v4 = vld [vmem:[#allocation2 + $0x5] sm:$0xf]  ;;  %v24_v5 = vmax.f32 %v23_v2, 0.0  ;;  %s192_s0 = smov [#allocation5]  }
  0x15   :  { %v48_v1 = vshrl.u32 %v47_v0, 7  ;;  %v124_v6 = vmul.f32 -1.442695, %v27_v3  ;;  %v38_v7 = vrot.slane %v36_v4, 1  ;;  %v41_v8 = vrot.slane %v36_v4, 2  ;;  %s112_s20 = sshll.u32 %s192_s0, 4  ;;  %s113_s20 = int_to_ptr.vmem [resolvable:$true] %s112_s20 }
  0x16   :  { %v44_v9 = vrot.slane %v36_v4, 3  ;;  %v75_v10 = vld [vmem:[#allocation2 + $0x9] sm:$0x7]  ;;  %26 = vst.msk [vmem:[#allocation5] sm:$0x7] %vm25_vm0, %v24_v5  ;;  %vm73_vm2 = vcmask 125952   ;;  %p168_p9 = scmp.lt.s32.totalorder %s113_s20, %s113_s20 }
  0x17   :  { %129 = vpow2.f32 %v124_v6  ;;  %v40_v11 = vmax.f32 %v36_v4, %v38_v7  ;;  %v77_v12 = vrot.slane %v75_v10, 1  ;;  %v80_v13 = vrot.slane %v75_v10, 2  ;;  %s163_s21 = scalar_lea.vmem %s113_s20, 256 }
  0x18   :  { %v49_v15 = vsub.s32 0, %v48_v1  ;;  %p164_p8 = scmp.ne.s32.totalorder %s113_s20, %s163_s21  ;;  %p169_p10 = scmp.lt.s32.totalorder %s163_s21, %s163_s21 }
  0x19   :  { %v43_v14 = vmax.f32 %v40_v11, %v41_v8  ;;  %v79_v16 = vmax.f32 %v75_v10, %v77_v12 }
  0x1a   :  { %p170_p11 = por %p169_p10, %p168_p9 }
  0x1b   :  { %v46_v17 = vmax.f32 %v43_v14, %v44_v9  ;;  %v82_v18 = vmax.f32 %v79_v16, %v80_v13 }
  0x1c   :  { %p171_p12 = pnand %p170_p11, %p164_p8 }
  0x1d   :  { %v50_v19 = vrot.slane %v46_v17, %v49_v15  ;;  %v86_v20 = vrot.slane %v82_v18, %v49_v15 }
  0x1f   :  { %v51_v21 = vsub.f32 %v36_v4, %v50_v19  ;;  %v87_v22 = vsub.f32 %v75_v10, %v86_v20 }
  0x21   :  { %v130_v23 = vpop.eup %129  ;;  %v52_v24 = vmul.f32 1.442695, %v51_v21  ;;  %v88_v25 = vmul.f32 1.442695, %v87_v22 }
  0x22   :  { %v31_v26 = vadd.f32 1.0, %v130_v23 }
  0x23   :  { %131 = vpow2.f32 %v52_v24 }
  0x24   :  { %133 = vrcp.f32 %v31_v26 }
  0x25   :  { %135 = vpow2.f32 %v88_v25 }
  0x2d   :  { %v132_v27 = vpop.eup %131 }
  0x2e   :  { %v134_v28 = vpop.eup %133  ;;  %v55_v29 = vrot.slane %v132_v27, 1  ;;  %v58_v30 = vrot.slane %v132_v27, 2  ;;  %v61_v33 = vrot.slane %v132_v27, 3 }
  0x2f   :  { %v136_v31 = vpop.eup %135  ;;  %35 = vst.msk [vmem:[#allocation5 + $0x3] sm:$0x3] %vm34_vm1, %v134_v28 }
  0x30   :  { %v57_v32 = vadd.f32 %v132_v27, %v55_v29  ;;  %v91_v34 = vrot.slane %v136_v31, 1  ;;  %v94_v35 = vrot.slane %v136_v31, 2 }
  0x32   :  { %v60_v36 = vadd.f32 %v58_v30, %v57_v32  ;;  %v93_v37 = vadd.f32 %v136_v31, %v91_v34 }
  0x34   :  { %v63_v38 = vadd.f32 %v61_v33, %v60_v36  ;;  %v96_v39 = vadd.f32 %v94_v35, %v93_v37 }
  0x36   :  { %137 = vrcp.f32 %v63_v38 }
  0x37   :  { %139 = vrcp.f32 %v96_v39 }
  0x40   :  { %v138_v40 = vpop.eup %137 }
  0x41   :  { %v140_v41 = vpop.eup %139  ;;  %v65_v42 = vmul.f32 %v138_v40, %v63_v38 }
  0x42   :  { %v98_v43 = vmul.f32 %v140_v41, %v96_v39 }
  0x43   :  { %v66_v44 = vsub.f32 2.0, %v65_v42 }
  0x44   :  { %v99_v45 = vsub.f32 2.0, %v98_v43 }
  0x45   :  { %v67_v46 = vmul.f32 %v138_v40, %v66_v44 }
  0x46   :  { %v100_v47 = vmul.f32 %v140_v41, %v99_v45 }
  0x47   :  { %v71_v48 = vrot.slane %v67_v46, %v49_v15 }
  0x48   :  { %v104_v49 = vrot.slane %v100_v47, %v49_v15 }
  0x49   :  { %v72_v50 = vmul.f32 %v132_v27, %v71_v48 }
  0x4a   :  { %v105_v51 = vmul.f32 %v136_v31, %v104_v49 }
  0x4b   :  { %74 = vst.msk [vmem:[#allocation5 + $0x5] sm:$0xf] %vm73_vm2, %v72_v50 }
  0x4c   :  { %106 = vst.msk [vmem:[#allocation5 + $0x9] sm:$0x7] %vm25_vm0, %v105_v51 }
  0x4d   :  { %174 = shalt.err (!%p171_p12)
}
  0x4e   :  { %s175_s24 = scalar_lea.hbm %s236_s1, 256 }
  0x4f   :  { %p176_p13 = scmp.ne.s32.totalorder %s236_s1, %s175_s24  ;;  %p179_p0 = scmp.lt.u32.totalorder %s175_s24, %s236_s1 }
  0x51   :  { %p181_p1 = pnand %p179_p0, %p176_p13 }
  0x53   :  { %184 = shalt.err (!%p181_p1)
}
  0x54   :  { %118 = dma.vmem_to_hbm [thread:$0]  %s113_s20, 256, %s236_s1, [#allocation4], %s190_s16, %s190_s16, %s191_s17  }
  0x55   :  { %187 = dma.done.wait [#allocation4], 256  }
  0x56   :  { %188 = vsyncadd [#allocation4], 4294967040 }
  0x57   :  { %122 = vsyncpa [#allocation3], 1 }
  0x58   :  { %123 = vsyncpa [#allocation4], 1 }

</bundles_post_ra>
